<compile_context>
chip_gen: v7x
topology: tpu7x:2x2x1
jax: 0.10.0
libtpu: 0.0.40
codegen_flags: <defaults>
</compile_context>

<pallas_src>
import jax
import jax.numpy as jnp
from jax.experimental import pallas as pl
from jax.experimental.pallas import tpu as pltpu


# ---------------------------------------------------------------------------
# Kernel
# ---------------------------------------------------------------------------

def _dense_t(w, b, x):
    """y = W @ x + b for tiny fan-in, unrolled as VPU broadcast-multiply-accumulates.

    w: [m, k] (k <= 5, PyTorch [out, in] layout), b: [m, 1], x: [k, n] with n the
    lane-dense batch tile.  Returns [m, n].  Avoids MXU push/pop round-trips that
    would scale with the (now very large) lane tile.
    """
    acc = b + w[:, 0:1] * x[0:1, :]
    for kk in range(1, w.shape[1]):
        acc = acc + w[:, kk:kk + 1] * x[kk:kk + 1, :]
    return acc


def _mlp_kernel(xT_ref, w1_ref, b1_ref, w2_ref, b2_ref, w3_ref, b3_ref, oT_ref):
    x = xT_ref[...]                                                   # [d_in, tb], batch on lanes
    h1 = jnp.maximum(_dense_t(w1_ref[...], b1_ref[...], x), 0.0)      # [d_h,  tb]
    h2 = jnp.maximum(_dense_t(w2_ref[...], b2_ref[...], h1), 0.0)     # [d_h,  tb]
    oT_ref[...] = _dense_t(w3_ref[...], b3_ref[...], h2).astype(oT_ref.dtype)  # [d_out, tb]


# ---------------------------------------------------------------------------
# Tiling policy
# ---------------------------------------------------------------------------

_LANE = 128
_MAX_TB = 256 * 1024                # reviewer-recommended upper end of the 64K-256K range
# Double-buffered VMEM budget for the xT + oT tiles.  Per batch lane the tiles cost
# 2 * 4 B * (d_in + d_out) ~= 56 B, so 24 MiB caps tb around 448K (we clamp at 256K
# anyway, ~14 MiB of tile VMEM -> safe on v5e/v6e/v7x with vmem_limit_bytes = 32 MiB).
_TILE_VMEM_BUDGET = 24 * 1024 * 1024
_VMEM_LIMIT_BYTES = 32 * 1024 * 1024   # raises v5e's 16 MiB scoped default; <= v6e/v7x defaults


def _round_up(x, m):
    return ((x + m - 1) // m) * m


def _pick_batch_tile(B, d_in, d_out):
    """Largest lane tile that (a) fits the double-buffered VMEM budget, (b) stays
    <= 256K lanes, and (c) leaves ~4 grid steps when B allows (pipeline overlap +
    even split across v7x's two TensorCores)."""
    per_lane_bytes = 2 * 4 * (d_in + d_out)              # double-buffered xT + oT columns
    cap = (_TILE_VMEM_BUDGET // per_lane_bytes) // _LANE * _LANE
    cap = max(_LANE, min(cap, _MAX_TB))
    want = _round_up(pl.cdiv(B, 4), _LANE)               # aim for 4 (even) grid steps
    return max(_LANE, min(cap, want))


# ---------------------------------------------------------------------------
# Entry points
# ---------------------------------------------------------------------------

def general_fit_forward_lanes(xT, params, *, batch_tile=None):
    """GeneralFit forward in the lane-major layout (the HBM-roofline path).

    xT: [d_in, B] float32  (batch on the trailing / lane axis)
    returns [d_out, B] float32.

    No transposes anywhere: producers should emit x already as [features, batch]
    and consumers take [d_out, B].  Ragged B is zero-padded to a tile multiple
    (one extra pass over x only when B is not already a multiple of the tile).
    """
    d_in, B = xT.shape
    d_h = params["w1"].shape[0]
    d_out = params["w3"].shape[0]

    tb = _pick_batch_tile(B, d_in, d_out) if batch_tile is None else batch_tile
    assert tb % _LANE == 0, "batch_tile must be a multiple of 128 lanes"

    B_pad = _round_up(B, tb)
    if B_pad != B:
        xT = jnp.pad(xT, ((0, 0), (0, B_pad - B)))        # zero columns; sliced off below
    grid = (B_pad // tb,)

    flops = 2 * B_pad * (d_in * d_h + d_h * d_h + d_h * d_out)
    param_bytes = sum(int(p.size) * p.dtype.itemsize for p in params.values())
    bytes_accessed = B_pad * d_in * 4 + B_pad * d_out * 4 + param_bytes
    cost = pl.CostEstimate(flops=flops, transcendentals=0, bytes_accessed=bytes_accessed)

    # Weights / biases are tiny: keep the full tensors VMEM-resident for every grid
    # step; only the batch (lane) dimension of xT / out is tiled.
    resident = lambda shape: pl.BlockSpec(shape, lambda i: (0, 0))

    oT = pl.pallas_call(
        _mlp_kernel,
        out_shape=jax.ShapeDtypeStruct((d_out, B_pad), jnp.float32),
        grid_spec=pltpu.PrefetchScalarGridSpec(
            num_scalar_prefetch=0,
            grid=grid,
            in_specs=[
                pl.BlockSpec((d_in, tb), lambda i: (0, i)),   # xT tile, batch on lanes
                resident((d_h, d_in)),                        # w1
                resident((d_h, 1)),                           # b1
                resident((d_h, d_h)),                         # w2
                resident((d_h, 1)),                           # b2
                resident((d_out, d_h)),                       # w3
                resident((d_out, 1)),                         # b3
            ],
            out_specs=pl.BlockSpec((d_out, tb), lambda i: (0, i)),
        ),
        compiler_params=pltpu.CompilerParams(
            dimension_semantics=("parallel",),                # megacore-shardable on v7x
            vmem_limit_bytes=_VMEM_LIMIT_BYTES,               # covers v5e's 16 MiB default
        ),
        cost_estimate=cost,
    )(xT, params["w1"], params["b1"], params["w2"], params["b2"],
      params["w3"], params["b3"])

    return oT[:, :B] if B_pad != B else oT


def general_fit_forward(x, params, *, min_pallas_batch=4096, batch_tile=None):
    """PyTorch-parity forward: x [B, d_in] -> [B, d_out], matching GeneralFit.forward.

    * B < min_pallas_batch: plain fused-XLA path (the fixed pallas_call / DMA setup
      cost would dominate such tiny batches).
    * Otherwise: one transpose each way into the lane-major kernel.  NOTE: at the
      HBM roofline those two XLA transposes roughly triple the traffic — large-batch
      callers should keep the [features, batch] layout end-to-end and call
      `general_fit_forward_lanes` directly (zero transposes).
    """
    B = x.shape[0]
    if B < min_pallas_batch:
        return reference_forward(x, params)
    return general_fit_forward_lanes(x.T, params, batch_tile=batch_tile).T


# ---------------------------------------------------------------------------
# Params / reference
# ---------------------------------------------------------------------------

def init_params(key, input_size, output_size, hidden_size=5):
    """Deterministic init mirroring GeneralFit.__init__ (native PyTorch [out, in] layout)."""
    k1, k2, k3, k4, k5, k6 = jax.random.split(key, 6)

    def linear(kw, kb, fan_in, fan_out):
        bound = 1.0 / jnp.sqrt(jnp.float32(fan_in))
        w = jax.random.uniform(kw, (fan_out, fan_in), jnp.float32, -bound, bound)
        b = jax.random.uniform(kb, (fan_out, 1), jnp.float32, -bound, bound)
        return w, b

    w1, b1 = linear(k1, k2, input_size, hidden_size)
    w2, b2 = linear(k3, k4, hidden_size, hidden_size)
    w3, b3 = linear(k5, k6, hidden_size, output_size)
    return {"w1": w1, "b1": b1, "w2": w2, "b2": b2, "w3": w3, "b3": b3}


def reference_forward(x, p):
    h1 = jnp.maximum(x @ p["w1"].T + p["b1"].T, 0.0)
    h2 = jnp.maximum(h1 @ p["w2"].T + p["b2"].T, 0.0)
    return h2 @ p["w3"].T + p["b3"].T


# ---------------------------------------------------------------------------
# Demo / correctness check
# ---------------------------------------------------------------------------

if __name__ == "__main__":
    # Iris-like shapes: input_size = 4 features, cats = sum(unique([0,1,2])) = 3 classes.
    input_size, output_size, hidden_size = 4, 3, 5

    key = jax.random.PRNGKey(0)
    kp, kx1, kx2 = jax.random.split(key, 3)
    params = init_params(kp, input_size, output_size, hidden_size)

    # 1) Iris-sized batch through the transpose-free lane-major path (one 128-lane tile).
    x_small = jax.random.normal(kx1, (8, input_size), dtype=jnp.float32)
    outT_small = jax.block_until_ready(general_fit_forward_lanes(x_small.T, params))
    ref_small = reference_forward(x_small, params)
    assert outT_small.shape == (output_size, 8)
    assert jnp.allclose(outT_small.T, ref_small, atol=1e-5, rtol=1e-5), "lanes-path mismatch"

    # 2) Ragged batch: exercises zero-padding to a tile multiple and the multi-step
    #    pipelined grid (tb=256 -> 4 grid steps), via the PyTorch-parity wrapper.
    x_big = jax.random.normal(kx2, (1000, input_size), dtype=jnp.float32)
    out_big = jax.block_until_ready(general_fit_forward(x_big, params, min_pallas_batch=0))
    ref_big = reference_forward(x_big, params)
    assert out_big.shape == (1000, output_size)
    assert jnp.allclose(out_big, ref_big, atol=1e-5, rtol=1e-5), "padded/tiled-batch mismatch"

    # 3) Tiny batch through the module-parity wrapper takes the fused-XLA path by default.
    out_xla = jax.block_until_ready(general_fit_forward(x_small, params))
    assert jnp.allclose(out_xla, ref_small, atol=1e-5, rtol=1e-5), "small-batch XLA path mismatch"

    print("KERNEL_OK")
</pallas_src>

<mosaic_0001>
module attributes {stable_mosaic.version = 11 : i64} {
  func.func @_mlp_kernel(%arg0: i32, %arg1: memref<4x128xf32, #tpu.memory_space<vmem>>, %arg2: memref<5x4xf32, #tpu.memory_space<vmem>>, %arg3: memref<5x1xf32, #tpu.memory_space<vmem>>, %arg4: memref<5x5xf32, #tpu.memory_space<vmem>>, %arg5: memref<5x1xf32, #tpu.memory_space<vmem>>, %arg6: memref<3x5xf32, #tpu.memory_space<vmem>>, %arg7: memref<3x1xf32, #tpu.memory_space<vmem>>, %arg8: memref<3x128xf32, #tpu.memory_space<vmem>>) attributes {dimension_semantics = [#tpu.dimension_semantics<parallel>], iteration_bounds = array<i64: 1>, scalar_prefetch = 0 : i64, scratch_operands = 0 : i64, tpu.core_type = #tpu.core_type<tc>, window_params = [{transform_indices = @transform_0, window_bounds = array<i64: 4, 128>}, {pipeline_mode = #tpu.pipeline_mode<synchronous>, transform_indices = @transform_1, window_bounds = array<i64: 5, 4>}, {pipeline_mode = #tpu.pipeline_mode<synchronous>, transform_indices = @transform_2, window_bounds = array<i64: 5, 1>}, {pipeline_mode = #tpu.pipeline_mode<synchronous>, transform_indices = @transform_3, window_bounds = array<i64: 5, 5>}, {pipeline_mode = #tpu.pipeline_mode<synchronous>, transform_indices = @transform_4, window_bounds = array<i64: 5, 1>}, {pipeline_mode = #tpu.pipeline_mode<synchronous>, transform_indices = @transform_5, window_bounds = array<i64: 3, 5>}, {pipeline_mode = #tpu.pipeline_mode<synchronous>, transform_indices = @transform_6, window_bounds = array<i64: 3, 1>}, {transform_indices = @transform_7, window_bounds = array<i64: 3, 128>}]} {
    %c0 = arith.constant 0 : index
    %c0_0 = arith.constant 0 : index
    %0 = vector.load %arg1[%c0, %c0_0] : memref<4x128xf32, #tpu.memory_space<vmem>>, vector<4x128xf32>
    %c0_1 = arith.constant 0 : index
    %c0_2 = arith.constant 0 : index
    %1 = vector.load %arg2[%c0_1, %c0_2] : memref<5x4xf32, #tpu.memory_space<vmem>>, vector<5x4xf32>
    %c0_3 = arith.constant 0 : index
    %c0_4 = arith.constant 0 : index
    %2 = vector.load %arg3[%c0_3, %c0_4] : memref<5x1xf32, #tpu.memory_space<vmem>>, vector<5x1xf32>
    %3 = vector.extract_strided_slice %1 {offsets = [0, 0], sizes = [5, 1], strides = [1, 1]} : vector<5x4xf32> to vector<5x1xf32>
    %4 = vector.extract_strided_slice %0 {offsets = [0, 0], sizes = [1, 128], strides = [1, 1]} : vector<4x128xf32> to vector<1x128xf32>
    %5 = vector.broadcast %3 : vector<5x1xf32> to vector<5x128xf32>
    %6 = vector.broadcast %4 : vector<1x128xf32> to vector<5x128xf32>
    %7 = arith.mulf %5, %6 : vector<5x128xf32>
    %8 = vector.broadcast %2 : vector<5x1xf32> to vector<5x128xf32>
    %9 = arith.addf %8, %7 : vector<5x128xf32>
    %10 = vector.extract_strided_slice %1 {offsets = [0, 1], sizes = [5, 1], strides = [1, 1]} : vector<5x4xf32> to vector<5x1xf32>
    %11 = vector.extract_strided_slice %0 {offsets = [1, 0], sizes = [1, 128], strides = [1, 1]} : vector<4x128xf32> to vector<1x128xf32>
    %12 = vector.broadcast %10 : vector<5x1xf32> to vector<5x128xf32>
    %13 = vector.broadcast %11 : vector<1x128xf32> to vector<5x128xf32>
    %14 = arith.mulf %12, %13 : vector<5x128xf32>
    %15 = arith.addf %9, %14 : vector<5x128xf32>
    %16 = vector.extract_strided_slice %1 {offsets = [0, 2], sizes = [5, 1], strides = [1, 1]} : vector<5x4xf32> to vector<5x1xf32>
    %17 = vector.extract_strided_slice %0 {offsets = [2, 0], sizes = [1, 128], strides = [1, 1]} : vector<4x128xf32> to vector<1x128xf32>
    %18 = vector.broadcast %16 : vector<5x1xf32> to vector<5x128xf32>
    %19 = vector.broadcast %17 : vector<1x128xf32> to vector<5x128xf32>
    %20 = arith.mulf %18, %19 : vector<5x128xf32>
    %21 = arith.addf %15, %20 : vector<5x128xf32>
    %22 = vector.extract_strided_slice %1 {offsets = [0, 3], sizes = [5, 1], strides = [1, 1]} : vector<5x4xf32> to vector<5x1xf32>
    %23 = vector.extract_strided_slice %0 {offsets = [3, 0], sizes = [1, 128], strides = [1, 1]} : vector<4x128xf32> to vector<1x128xf32>
    %24 = vector.broadcast %22 : vector<5x1xf32> to vector<5x128xf32>
    %25 = vector.broadcast %23 : vector<1x128xf32> to vector<5x128xf32>
    %26 = arith.mulf %24, %25 : vector<5x128xf32>
    %27 = arith.addf %21, %26 : vector<5x128xf32>
    %cst = arith.constant 0.000000e+00 : f32
    %28 = vector.broadcast %cst : f32 to vector<5x128xf32>
    %29 = arith.maximumf %27, %28 : vector<5x128xf32>
    %c0_5 = arith.constant 0 : index
    %c0_6 = arith.constant 0 : index
    %30 = vector.load %arg4[%c0_5, %c0_6] : memref<5x5xf32, #tpu.memory_space<vmem>>, vector<5x5xf32>
    %c0_7 = arith.constant 0 : index
    %c0_8 = arith.constant 0 : index
    %31 = vector.load %arg5[%c0_7, %c0_8] : memref<5x1xf32, #tpu.memory_space<vmem>>, vector<5x1xf32>
    %32 = vector.extract_strided_slice %30 {offsets = [0, 0], sizes = [5, 1], strides = [1, 1]} : vector<5x5xf32> to vector<5x1xf32>
    %33 = vector.extract_strided_slice %29 {offsets = [0, 0], sizes = [1, 128], strides = [1, 1]} : vector<5x128xf32> to vector<1x128xf32>
    %34 = vector.broadcast %32 : vector<5x1xf32> to vector<5x128xf32>
    %35 = vector.broadcast %33 : vector<1x128xf32> to vector<5x128xf32>
    %36 = arith.mulf %34, %35 : vector<5x128xf32>
    %37 = vector.broadcast %31 : vector<5x1xf32> to vector<5x128xf32>
    %38 = arith.addf %37, %36 : vector<5x128xf32>
    %39 = vector.extract_strided_slice %30 {offsets = [0, 1], sizes = [5, 1], strides = [1, 1]} : vector<5x5xf32> to vector<5x1xf32>
    %40 = vector.extract_strided_slice %29 {offsets = [1, 0], sizes = [1, 128], strides = [1, 1]} : vector<5x128xf32> to vector<1x128xf32>
    %41 = vector.broadcast %39 : vector<5x1xf32> to vector<5x128xf32>
    %42 = vector.broadcast %40 : vector<1x128xf32> to vector<5x128xf32>
    %43 = arith.mulf %41, %42 : vector<5x128xf32>
    %44 = arith.addf %38, %43 : vector<5x128xf32>
    %45 = vector.extract_strided_slice %30 {offsets = [0, 2], sizes = [5, 1], strides = [1, 1]} : vector<5x5xf32> to vector<5x1xf32>
    %46 = vector.extract_strided_slice %29 {offsets = [2, 0], sizes = [1, 128], strides = [1, 1]} : vector<5x128xf32> to vector<1x128xf32>
    %47 = vector.broadcast %45 : vector<5x1xf32> to vector<5x128xf32>
    %48 = vector.broadcast %46 : vector<1x128xf32> to vector<5x128xf32>
    %49 = arith.mulf %47, %48 : vector<5x128xf32>
    %50 = arith.addf %44, %49 : vector<5x128xf32>
    %51 = vector.extract_strided_slice %30 {offsets = [0, 3], sizes = [5, 1], strides = [1, 1]} : vector<5x5xf32> to vector<5x1xf32>
    %52 = vector.extract_strided_slice %29 {offsets = [3, 0], sizes = [1, 128], strides = [1, 1]} : vector<5x128xf32> to vector<1x128xf32>
    %53 = vector.broadcast %51 : vector<5x1xf32> to vector<5x128xf32>
    %54 = vector.broadcast %52 : vector<1x128xf32> to vector<5x128xf32>
    %55 = arith.mulf %53, %54 : vector<5x128xf32>
    %56 = arith.addf %50, %55 : vector<5x128xf32>
    %57 = vector.extract_strided_slice %30 {offsets = [0, 4], sizes = [5, 1], strides = [1, 1]} : vector<5x5xf32> to vector<5x1xf32>
    %58 = vector.extract_strided_slice %29 {offsets = [4, 0], sizes = [1, 128], strides = [1, 1]} : vector<5x128xf32> to vector<1x128xf32>
    %59 = vector.broadcast %57 : vector<5x1xf32> to vector<5x128xf32>
    %60 = vector.broadcast %58 : vector<1x128xf32> to vector<5x128xf32>
    %61 = arith.mulf %59, %60 : vector<5x128xf32>
    %62 = arith.addf %56, %61 : vector<5x128xf32>
    %cst_9 = arith.constant 0.000000e+00 : f32
    %63 = vector.broadcast %cst_9 : f32 to vector<5x128xf32>
    %64 = arith.maximumf %62, %63 : vector<5x128xf32>
    %c0_10 = arith.constant 0 : index
    %c0_11 = arith.constant 0 : index
    %65 = vector.load %arg6[%c0_10, %c0_11] : memref<3x5xf32, #tpu.memory_space<vmem>>, vector<3x5xf32>
    %c0_12 = arith.constant 0 : index
    %c0_13 = arith.constant 0 : index
    %66 = vector.load %arg7[%c0_12, %c0_13] : memref<3x1xf32, #tpu.memory_space<vmem>>, vector<3x1xf32>
    %67 = vector.extract_strided_slice %65 {offsets = [0, 0], sizes = [3, 1], strides = [1, 1]} : vector<3x5xf32> to vector<3x1xf32>
    %68 = vector.extract_strided_slice %64 {offsets = [0, 0], sizes = [1, 128], strides = [1, 1]} : vector<5x128xf32> to vector<1x128xf32>
    %69 = vector.broadcast %67 : vector<3x1xf32> to vector<3x128xf32>
    %70 = vector.broadcast %68 : vector<1x128xf32> to vector<3x128xf32>
    %71 = arith.mulf %69, %70 : vector<3x128xf32>
    %72 = vector.broadcast %66 : vector<3x1xf32> to vector<3x128xf32>
    %73 = arith.addf %72, %71 : vector<3x128xf32>
    %74 = vector.extract_strided_slice %65 {offsets = [0, 1], sizes = [3, 1], strides = [1, 1]} : vector<3x5xf32> to vector<3x1xf32>
    %75 = vector.extract_strided_slice %64 {offsets = [1, 0], sizes = [1, 128], strides = [1, 1]} : vector<5x128xf32> to vector<1x128xf32>
    %76 = vector.broadcast %74 : vector<3x1xf32> to vector<3x128xf32>
    %77 = vector.broadcast %75 : vector<1x128xf32> to vector<3x128xf32>
    %78 = arith.mulf %76, %77 : vector<3x128xf32>
    %79 = arith.addf %73, %78 : vector<3x128xf32>
    %80 = vector.extract_strided_slice %65 {offsets = [0, 2], sizes = [3, 1], strides = [1, 1]} : vector<3x5xf32> to vector<3x1xf32>
    %81 = vector.extract_strided_slice %64 {offsets = [2, 0], sizes = [1, 128], strides = [1, 1]} : vector<5x128xf32> to vector<1x128xf32>
    %82 = vector.broadcast %80 : vector<3x1xf32> to vector<3x128xf32>
    %83 = vector.broadcast %81 : vector<1x128xf32> to vector<3x128xf32>
    %84 = arith.mulf %82, %83 : vector<3x128xf32>
    %85 = arith.addf %79, %84 : vector<3x128xf32>
    %86 = vector.extract_strided_slice %65 {offsets = [0, 3], sizes = [3, 1], strides = [1, 1]} : vector<3x5xf32> to vector<3x1xf32>
    %87 = vector.extract_strided_slice %64 {offsets = [3, 0], sizes = [1, 128], strides = [1, 1]} : vector<5x128xf32> to vector<1x128xf32>
    %88 = vector.broadcast %86 : vector<3x1xf32> to vector<3x128xf32>
    %89 = vector.broadcast %87 : vector<1x128xf32> to vector<3x128xf32>
    %90 = arith.mulf %88, %89 : vector<3x128xf32>
    %91 = arith.addf %85, %90 : vector<3x128xf32>
    %92 = vector.extract_strided_slice %65 {offsets = [0, 4], sizes = [3, 1], strides = [1, 1]} : vector<3x5xf32> to vector<3x1xf32>
    %93 = vector.extract_strided_slice %64 {offsets = [4, 0], sizes = [1, 128], strides = [1, 1]} : vector<5x128xf32> to vector<1x128xf32>
    %94 = vector.broadcast %92 : vector<3x1xf32> to vector<3x128xf32>
    %95 = vector.broadcast %93 : vector<1x128xf32> to vector<3x128xf32>
    %96 = arith.mulf %94, %95 : vector<3x128xf32>
    %97 = arith.addf %91, %96 : vector<3x128xf32>
    %c0_14 = arith.constant 0 : index
    %c0_15 = arith.constant 0 : index
    %98 = vector.load %arg8[%c0_14, %c0_15] : memref<3x128xf32, #tpu.memory_space<vmem>>, vector<3x128xf32>
    tpu.vector_store %arg8[%c0_14, %c0_15], %97 {strides = array<i32>} : memref<3x128xf32, #tpu.memory_space<vmem>>, vector<3x128xf32>,
    return
  }
  func.func @transform_0(%arg0: i32) -> (i32, i32) {
    %c0_i32 = arith.constant 0 : i32
    %c0_i32_0 = arith.constant 0 : i32
    return %c0_i32, %arg0 : i32, i32
  }
  func.func @transform_1(%arg0: i32) -> (i32, i32) {
    %c0_i32 = arith.constant 0 : i32
    %c0_i32_0 = arith.constant 0 : i32
    %c0_i32_1 = arith.constant 0 : i32
    return %c0_i32, %c0_i32_0 : i32, i32
  }
  func.func @transform_2(%arg0: i32) -> (i32, i32) {
    %c0_i32 = arith.constant 0 : i32
    %c0_i32_0 = arith.constant 0 : i32
    %c0_i32_1 = arith.constant 0 : i32
    return %c0_i32, %c0_i32_0 : i32, i32
  }
  func.func @transform_3(%arg0: i32) -> (i32, i32) {
    %c0_i32 = arith.constant 0 : i32
    %c0_i32_0 = arith.constant 0 : i32
    %c0_i32_1 = arith.constant 0 : i32
    return %c0_i32, %c0_i32_0 : i32, i32
  }
  func.func @transform_4(%arg0: i32) -> (i32, i32) {
    %c0_i32 = arith.constant 0 : i32
    %c0_i32_0 = arith.constant 0 : i32
    %c0_i32_1 = arith.constant 0 : i32
    return %c0_i32, %c0_i32_0 : i32, i32
  }
  func.func @transform_5(%arg0: i32) -> (i32, i32) {
    %c0_i32 = arith.constant 0 : i32
    %c0_i32_0 = arith.constant 0 : i32
    %c0_i32_1 = arith.constant 0 : i32
    return %c0_i32, %c0_i32_0 : i32, i32
  }
  func.func @transform_6(%arg0: i32) -> (i32, i32) {
    %c0_i32 = arith.constant 0 : i32
    %c0_i32_0 = arith.constant 0 : i32
    %c0_i32_1 = arith.constant 0 : i32
    return %c0_i32, %c0_i32_0 : i32, i32
  }
  func.func @transform_7(%arg0: i32) -> (i32, i32) {
    %c0_i32 = arith.constant 0 : i32
    %c0_i32_0 = arith.constant 0 : i32
    return %c0_i32, %arg0 : i32, i32
  }
}

</mosaic_0001>

<bundles_post_ra>
// kernel: tpu_custom_call.1
= control target key start
LH: loop header
LB: loop body
LE: loop exit
PB: predicated region body
PF: predicated region fallthrough
CT: control target
= control target key end

     0   :  { %v253_v1 = vmov 1   ;;  %v254_v2 = vmov 0   ;;  %s332_s0 = inlined_call_operand.vmem [shape: f32[4,128], index: 0, kind: input, shape index: {}]   ;;  %s333_s1 = inlined_call_operand.vmem [shape: f32[5,4], index: 1, kind: input, shape index: {}]   ;;  %s334_s2 = inlined_call_operand.vmem [shape: f32[5,1], index: 2, kind: input, shape index: {}]   ;;  %s335_s3 = inlined_call_operand.vmem [shape: f32[5,5], index: 3, kind: input, shape index: {}]   ;;  %s336_s4 = inlined_call_operand.vmem [shape: f32[5,1], index: 4, kind: input, shape index: {}]   ;;  %s337_s5 = inlined_call_operand.vmem [shape: f32[3,5], index: 5, kind: input, shape index: {}]   ;;  %s338_s6 = inlined_call_operand.vmem [shape: f32[3,1], index: 6, kind: input, shape index: {}]   ;;  %s339_s7 = inlined_call_operand.hbm [shape: f32[3,128], index: 7, kind: output, shape index: {}]  }
   0x1   :  { %v28_v0 = vld [vmem:[%s333_s1] sm:$0x1f]  ;;  %216 = vset.pattern.permute.xlu1 %v253_v1  ;;  %215 = vset.pattern.permute.xlu0 %v254_v2 }
   0x2   :  { %47 = vperm.xlu1 %216, %v28_v0   ;;  %32 = vperm.xlu0 %215, %v28_v0   ;;  %v29_v3 = vld [vmem:[%s334_s2] sm:$0x1f] }
   0x3   :  { %12 = vsyncpa [#allocation3], 0  ;;  %v255_v4 = vmov 2   ;;  %v77_v5 = vld [vmem:[%s335_s3] sm:$0x1f]  ;;  %v256_v6 = vmov 3   ;;  %v35_v11 = vlaneseq }
   0x4   :  { %v78_v7 = vld [vmem:[%s336_s4] sm:$0x1f]  ;;  %v257_v8 = vmov 4  }
   0x5   :  { %v136_v9 = vld [vmem:[%s337_s5] sm:$0x7]  ;;  %v36_v12 = vshrl.u32 %v35_v11, 7 }
   0x6   :  { %217 = vset.pattern.permute.xlu1 %v255_v4  ;;  %42 = vperm.xlu0 %215, %v29_v3   ;;  %v137_v10 = vld [vmem:[%s338_s6] sm:$0x7] }
   0x7   :  { %57 = vperm.xlu1 %217, %v28_v0   ;;  %v37_v13 = vsub.s32 0, %v36_v12  ;;  %v27_v14 = vld [vmem:[%s332_s0] sm:$0xf]  ;;  %v52_v15 = vsub.s32 1, %v36_v12  ;;  %v62_v17 = vsub.s32 2, %v36_v12  ;;  %v72_v23 = vsub.s32 3, %v36_v12 }
   0x8   :  { %v131_v46 = vsub.s32 4, %v36_v12  ;;  %s258_s0 = smov [#allocation2]  }
   0x9   :  { %v38_v16 = vrot.slane %v27_v14, %v37_v13  ;;  %v53_v20 = vrot.slane %v27_v14, %v52_v15  ;;  %v63_v22 = vrot.slane %v27_v14, %v62_v17  ;;  %v73_v29 = vrot.slane %v27_v14, %v72_v23  ;;  %s201_s6 = sshll.u32 %s258_s0, 4  ;;  %s202_s6 = int_to_ptr.vmem [resolvable:$true] %s201_s6 }
   0xa   :  { %218 = vset.pattern.permute.xlu0 %v256_v6  ;;  %s229_s10 = scalar_lea.vmem %s202_s6, 64  ;;  %p234_p1 = scmp.lt.s32.totalorder %s202_s6, %s202_s6 }
   0xb   :  { %219 = vset.pattern.permute.xlu1 %v254_v2  ;;  %67 = vperm.xlu0 %218, %v28_v0   ;;  %p230_p0 = scmp.ne.s32.totalorder %s202_s6, %s229_s10  ;;  %p235_p2 = scmp.lt.s32.totalorder %s229_s10, %s229_s10 }
   0xc   :  { %81 = vperm.xlu1 %219, %v77_v5  }
   0xd   :  { %p236_p3 = por %p235_p2, %p234_p1 }
   0xf   :  { %220 = vset.pattern.permute.xlu0 %v253_v1  ;;  %p237_p4 = pnand %p236_p3, %p230_p0 }
  0x10   :  { %91 = vperm.xlu1 %219, %v78_v7   ;;  %96 = vperm.xlu0 %220, %v77_v5  }
  0x14   :  { %221 = vset.pattern.permute.xlu1 %v255_v4  ;;  %223 = vset.pattern.permute.xlu0 %v257_v8 }
  0x15   :  { %106 = vperm.xlu1 %221, %v77_v5   ;;  %126 = vperm.xlu0 %223, %v77_v5  }
  0x19   :  { %222 = vset.pattern.permute.xlu1 %v256_v6  ;;  %225 = vset.pattern.permute.xlu0 %v253_v1 }
  0x1a   :  { %116 = vperm.xlu1 %222, %v77_v5   ;;  %155 = vperm.xlu0 %225, %v136_v9  }
  0x1e   :  { %224 = vset.pattern.permute.xlu1 %v254_v2  ;;  %228 = vset.pattern.permute.xlu0 %v257_v8 }
  0x1f   :  { %140 = vperm.xlu1 %224, %v136_v9   ;;  %185 = vperm.xlu0 %228, %v136_v9  }
  0x23   :  { %150 = vperm.xlu1 %224, %v137_v10  }
  0x27   :  { %226 = vset.pattern.permute.xlu1 %v255_v4 }
  0x28   :  { %165 = vperm.xlu1 %226, %v136_v9  }
  0x2c   :  { %227 = vset.pattern.permute.xlu1 %v256_v6 }
  0x2d   :  { %175 = vperm.xlu1 %227, %v136_v9  }
  0x81   :  { %v48_v18 = vpop.permute.xlu1 %47  ;;  %v33_v19 = vpop.permute.xlu0 %32 }
  0x82   :  { %v39_v21 = vmul.f32 %v38_v16, %v33_v19  ;;  %v54_v25 = vmul.f32 %v53_v20, %v48_v18 }
  0x85   :  { %v43_v24 = vpop.permute.xlu0 %42 }
  0x86   :  { %v45_v26 = vadd.f32 %v43_v24, %v39_v21  ;;  %v58_v27 = vpop.permute.xlu1 %57 }
  0x87   :  { %v64_v28 = vmul.f32 %v63_v22, %v58_v27 }
  0x88   :  { %v55_v30 = vadd.f32 %v54_v25, %v45_v26 }
  0x8a   :  { %v65_v31 = vadd.f32 %v64_v28, %v55_v30  ;;  %v68_v32 = vpop.permute.xlu0 %67 }
  0x8b   :  { %v74_v33 = vmul.f32 %v73_v29, %v68_v32  ;;  %v82_v34 = vpop.permute.xlu1 %81 }
  0x8d   :  { %v75_v35 = vadd.f32 %v74_v33, %v65_v31 }
  0x8f   :  { %v76_v36 = vmax.f32 %v75_v35, 0.0  ;;  %v92_v37 = vpop.permute.xlu1 %91  ;;  %v97_v41 = vpop.permute.xlu0 %96 }
  0x91   :  { %v87_v38 = vrot.slane %v76_v36, %v37_v13  ;;  %v102_v39 = vrot.slane %v76_v36, %v52_v15  ;;  %v112_v45 = vrot.slane %v76_v36, %v62_v17  ;;  %v122_v49 = vrot.slane %v76_v36, %v72_v23 }
  0x92   :  { %v132_v53 = vrot.slane %v76_v36, %v131_v46 }
  0x93   :  { %v88_v40 = vmul.f32 %v87_v38, %v82_v34  ;;  %v103_v44 = vmul.f32 %v102_v39, %v97_v41 }
  0x94   :  { %v107_v42 = vpop.permute.xlu1 %106  ;;  %v127_v51 = vpop.permute.xlu0 %126 }
  0x95   :  { %v94_v43 = vadd.f32 %v92_v37, %v88_v40  ;;  %v113_v48 = vmul.f32 %v112_v45, %v107_v42  ;;  %v133_v55 = vmul.f32 %v132_v53, %v127_v51 }
  0x97   :  { %v104_v47 = vadd.f32 %v103_v44, %v94_v43 }
  0x99   :  { %v114_v50 = vadd.f32 %v113_v48, %v104_v47  ;;  %v117_v52 = vpop.permute.xlu1 %116  ;;  %v156_v0 = vpop.permute.xlu0 %155 }
  0x9a   :  { %v123_v54 = vmul.f32 %v122_v49, %v117_v52 }
  0x9c   :  { %v124_v56 = vadd.f32 %v123_v54, %v114_v50 }
  0x9e   :  { %v134_v57 = vadd.f32 %v133_v55, %v124_v56  ;;  %v141_v58 = vpop.permute.xlu1 %140  ;;  %v186_v9 = vpop.permute.xlu0 %185 }
  0xa0   :  { %v135_v59 = vmax.f32 %v134_v57, 0.0 }
  0xa2   :  { %v146_v60 = vrot.slane %v135_v59, %v37_v13  ;;  %v151_v61 = vpop.permute.xlu1 %150  ;;  %v161_v62 = vrot.slane %v135_v59, %v52_v15  ;;  %v171_v4 = vrot.slane %v135_v59, %v62_v17  ;;  %v191_v7 = vrot.slane %v135_v59, %v131_v46 }
  0xa3   :  { %v181_v8 = vrot.slane %v135_v59, %v72_v23 }
  0xa4   :  { %v147_v63 = vmul.f32 %v146_v60, %v141_v58  ;;  %v162_v2 = vmul.f32 %v161_v62, %v156_v0  ;;  %v192_v14 = vmul.f32 %v191_v7, %v186_v9 }
  0xa6   :  { %v153_v1 = vadd.f32 %v151_v61, %v147_v63 }
  0xa7   :  { %v166_v3 = vpop.permute.xlu1 %165 }
  0xa8   :  { %v163_v5 = vadd.f32 %v162_v2, %v153_v1  ;;  %v172_v6 = vmul.f32 %v171_v4, %v166_v3 }
  0xaa   :  { %v173_v11 = vadd.f32 %v172_v6, %v163_v5 }
  0xac   :  { %v176_v10 = vpop.permute.xlu1 %175 }
  0xad   :  { %v182_v12 = vmul.f32 %v181_v8, %v176_v10 }
  0xaf   :  { %v183_v13 = vadd.f32 %v182_v12, %v173_v11 }
  0xb1   :  { %v193_v16 = vadd.f32 %v192_v14, %v183_v13 }
  0xb3   :  { %194 = vst [vmem:[#allocation2] sm:$0x7] %v193_v16 }
  0xb4   :  { %240 = shalt.err (!%p237_p4)
}
  0xb5   :  { %s241_s13 = scalar_lea.hbm %s339_s7, 64 }
  0xb6   :  { %p242_p5 = scmp.ne.s32.totalorder %s339_s7, %s241_s13  ;;  %p245_p6 = scmp.lt.u32.totalorder %s241_s13, %s339_s7 }
  0xb8   :  { %p247_p7 = pnand %p245_p6, %p242_p5 }
  0xba   :  { %250 = shalt.err (!%p247_p7)
}
  0xbb   :  { %204 = dma.vmem_to_hbm [thread:$0]  %s202_s6, 64, %s339_s7, [#allocation3]  }
  0xbc   :  { %251 = dma.done.wait [#allocation3], 64  }
  0xbd   :  { %252 = vsyncadd [#allocation3], 4294967232 }
  0xbe   :  { %208 = vsyncpa [#allocation3], 1 }

</bundles_post_ra>
